<compile_context>
chip_gen: v7x
topology: tpu7x:2x2x1
jax: 0.10.0
libtpu: 0.0.40
codegen_flags: <defaults>
</compile_context>

<pallas_src>
import functools

import jax
import jax.numpy as jnp
import numpy as np
from jax import lax
from jax.experimental import pallas as pl
from jax.experimental.pallas import tpu as pltpu


def _round_up(x, m):
    return ((x + m - 1) // m) * m


def _transpose_via_mxu(x):
    """(n, c) -> (c, n) via an identity matmul on the MXU.

    The HBM tile arrives anchor-major ((tile_a, K) / (tile_a, 4)), i.e. in
    lane-sparse vregs.  Contracting it against a small identity with an
    A @ B^T dot_general (the same dimension numbers flash attention uses)
    produces the lane-dense (c, tile_a) layout without relying on XLU
    transpose lowering for odd shapes.  The MXU is otherwise idle here.
    """
    n, c = x.shape
    rows = max(8, _round_up(c, 8))
    eye = (lax.broadcasted_iota(jnp.int32, (rows, c), 0)
           == lax.broadcasted_iota(jnp.int32, (rows, c), 1)).astype(x.dtype)
    xt = lax.dot_general(eye, x, (((1,), (1,)), ((), ())),
                         preferred_element_type=jnp.float32)
    return xt[:c, :]


def _smooth_l1(z):
    a = jnp.abs(z)
    return jnp.where(a <= 1.0 / 9.0, 4.5 * a * a, a - 1.0 / 18.0)


def _focal_loss_kernel(cls_ref, loc_ref, anc_ref, ann_ref, annT_ref,
                       cls_out, loc_out, pos_out,
                       *, alpha, gamma, num_anchors):
    t_idx = pl.program_id(1)
    TA = anc_ref.shape[1]
    K = cls_ref.shape[2]
    M = ann_ref.shape[1]

    # ---- anchor features for this tile (anchor axis on lanes), recomputed ----
    ax1 = anc_ref[0:1, :].astype(jnp.float32)
    ay1 = anc_ref[1:2, :].astype(jnp.float32)
    ax2 = anc_ref[2:3, :].astype(jnp.float32)
    ay2 = anc_ref[3:4, :].astype(jnp.float32)
    aw = ax2 - ax1
    ah = ay2 - ay1
    area_a = aw * ah
    acx = ax1 + 0.5 * aw
    acy = ay1 + 0.5 * ah
    inv_aw = 1.0 / aw
    inv_ah = 1.0 / ah
    # Lanes past the true anchor count (ragged last tile) hold stale VMEM data;
    # they are excluded from every decision below.
    a_idx = t_idx * TA + lax.broadcasted_iota(jnp.int32, (1, TA), 1)
    avalid = a_idx < num_anchors                               # (1, TA)

    # ---- annotations (tiny, per-batch) ----
    ann = ann_ref[0].astype(jnp.float32)                       # (M, 5)
    annT = annT_ref[0].astype(jnp.float32)                     # (5, M)
    gx1 = ann[:, 0:1]
    gy1 = ann[:, 1:2]
    gx2 = ann[:, 2:3]
    gy2 = ann[:, 3:4]
    valid = gx1 != -1.0                                        # (M, 1) pad rows are -1

    # ---- IoU of every annotation vs every anchor in this tile: (M, TA) ----
    # TODO(synk): cal_iou is not defined in the source module; standard IoU assumed.
    iw = jnp.maximum(jnp.minimum(ax2, gx2) - jnp.maximum(ax1, gx1), 0.0)
    ih = jnp.maximum(jnp.minimum(ay2, gy2) - jnp.maximum(ay1, gy1), 0.0)
    inter = iw * ih
    area_g = (gx2 - gx1) * (gy2 - gy1)                         # (M, 1)
    union = jnp.maximum(area_a + area_g - inter, 1e-8)         # benign clamp; real anchors have area > 0
    iou = inter / union                                        # exact divide (threshold fidelity)
    iou = jnp.where(valid, iou, -1.0)                          # invalid annotations never win

    iou_max = jnp.max(iou, axis=0, keepdims=True)              # (1, TA)
    iota_m = lax.broadcasted_iota(jnp.int32, (M, TA), 0)
    # first annotation attaining the max (ties broken toward lowest index)
    argmax = jnp.min(jnp.where(iou >= iou_max, iota_m, M), axis=0, keepdims=True)
    onehot_m = (iota_m == argmax).astype(jnp.float32)          # (M, TA)

    # gather assigned gt box / label with one MXU matmul: (5, TA)
    gt = jnp.dot(annT, onehot_m, preferred_element_type=jnp.float32)

    pos = jnp.logical_and(iou_max >= 0.5, avalid)              # (1, TA)
    assigned = jnp.logical_and(jnp.logical_or(pos, iou_max < 0.4), avalid)
    pos_f = pos.astype(jnp.float32)

    # ---- classification focal loss on a lane-dense (K, TA) tile ----
    clsT = _transpose_via_mxu(cls_ref[0])                      # (K, TA) f32
    p = jnp.clip(clsT, 0.0001, 1.0 - 0.0001)
    gt_lab = gt[4:5, :].astype(jnp.int32)                      # (1, TA)
    iota_k = lax.broadcasted_iota(jnp.int32, (K, TA), 0)
    tgt = jnp.logical_and(pos, iota_k == gt_lab)               # (K, TA)
    alpha_w = jnp.where(tgt, alpha, 1.0 - alpha)
    pt = jnp.where(tgt, p, 1.0 - p)
    one_minus_pt = 1.0 - pt
    if float(gamma) == 2.0:
        fw = one_minus_pt * one_minus_pt
    else:
        fw = jnp.power(one_minus_pt, gamma)
    # identical to -(t*log(p) + (1-t)*log(1-p)) for t in {0,1}; one EUP log/elem
    cls_elem = jnp.where(assigned, alpha_w * fw * (-jnp.log(pt)), 0.0)
    cls_sum = jnp.sum(jnp.sum(cls_elem, axis=0, keepdims=True),
                      axis=1, keepdims=True)                   # (1, 1)

    # ---- localization smooth-L1 (positives only), per-component rows ----
    locT = _transpose_via_mxu(loc_ref[0])                      # (4, TA) f32
    gt_x1 = gt[0:1, :]
    gt_y1 = gt[1:2, :]
    gt_x2 = gt[2:3, :]
    gt_y2 = gt[3:4, :]
    gw = gt_x2 - gt_x1
    gh = gt_y2 - gt_y1
    gcx = gt_x1 + 0.5 * gw
    gcy = gt_y1 + 0.5 * gh
    gw = jnp.maximum(gw, 1.0)
    gh = jnp.maximum(gh, 1.0)
    dx = (gcx - acx) * inv_aw * 10.0       # / 0.1
    dy = (gcy - acy) * inv_ah * 10.0       # / 0.1
    dw = jnp.log(gw * inv_aw) * 5.0        # / 0.2
    dh = jnp.log(gh * inv_ah) * 5.0        # / 0.2
    loc_row = (_smooth_l1(dx - locT[0:1, :]) + _smooth_l1(dy - locT[1:2, :])
               + _smooth_l1(dw - locT[2:3, :]) + _smooth_l1(dh - locT[3:4, :]))
    loc_row = jnp.where(pos, loc_row, 0.0)                     # where-gating keeps ragged-tile garbage out
    loc_sum = jnp.sum(loc_row, axis=1, keepdims=True)          # (1, 1)
    pos_cnt = jnp.sum(pos_f, axis=1, keepdims=True)            # (1, 1)

    # ---- per-(batch, tile) partial sums; reduced across tiles in the wrapper ----
    cls_out[0, 0] = cls_sum
    loc_out[0, 0] = loc_sum
    pos_out[0, 0] = pos_cnt


def focal_loss(classification, localization, anchors, annotations,
               alpha=0.25, gamma=2.0, tile_a=None):
    """classification (B,A,K) probabilities, localization (B,A,4), anchors (A,4),
    annotations (B,M,5) with rows of -1 as padding. Returns ((1,), (1,))."""
    B, A, K = classification.shape
    M = annotations.shape[1]

    # ---- K/M-aware anchor tiling: target a multi-MiB per-step working set ----
    # (inputs are double-buffered; roughly 6 (K,TA) + 3 (M,TA) f32 temps live.)
    if tile_a is None:
        bytes_per_anchor = 4 * (2 * (K + 8) + 6 * K + 3 * M + 24)
        tile_a = (8 * 1024 * 1024) // max(bytes_per_anchor, 1)
        tile_a = max(512, min(8192, tile_a))   # 8192 sized against v7x's 64 MiB VMEM
    if tile_a >= A:
        tile_a = A                              # one full-extent tile (always legal)
    else:
        tile_a = max(128, (tile_a // 128) * 128)
    n_tiles = -(-A // tile_a)

    # Big tensors are passed through untouched (no HBM relayout passes); only
    # the tiny anchor / annotation arrays are reshaped here.
    anchors_t = jnp.transpose(anchors.astype(jnp.float32))      # (4, A)
    annotations = annotations.astype(jnp.float32)
    ann_t = jnp.transpose(annotations, (0, 2, 1))               # (B, 5, M)

    kernel = functools.partial(_focal_loss_kernel, alpha=float(alpha),
                               gamma=float(gamma), num_anchors=A)

    part_shape = jax.ShapeDtypeStruct((B, n_tiles, 1, 1), jnp.float32)
    cls_part, loc_part, pos_part = pl.pallas_call(
        kernel,
        out_shape=(part_shape, part_shape, part_shape),
        grid_spec=pltpu.PrefetchScalarGridSpec(
            num_scalar_prefetch=0,
            grid=(B, n_tiles),
            in_specs=[
                pl.BlockSpec((1, tile_a, K), lambda b, t: (b, t, 0)),  # classification (as produced)
                pl.BlockSpec((1, tile_a, 4), lambda b, t: (b, t, 0)),  # localization (as produced)
                pl.BlockSpec((4, tile_a),    lambda b, t: (0, t)),     # anchor x1,y1,x2,y2
                pl.BlockSpec((1, M, 5),      lambda b, t: (b, 0, 0)),  # annotations (M,5)
                pl.BlockSpec((1, 5, M),      lambda b, t: (b, 0, 0)),  # annotations^T (5,M)
            ],
            out_specs=[
                pl.BlockSpec((1, 1, 1, 1), lambda b, t: (b, t, 0, 0)),
                pl.BlockSpec((1, 1, 1, 1), lambda b, t: (b, t, 0, 0)),
                pl.BlockSpec((1, 1, 1, 1), lambda b, t: (b, t, 0, 0)),
            ],
        ),
        compiler_params=pltpu.CompilerParams(
            # both axes parallel: v7x megacore can split batch OR anchor tiles
            dimension_semantics=("parallel", "parallel"),
            vmem_limit_bytes=48 * 1024 * 1024),   # fits v7x's 64 MiB; plenty for v5e/v6e
    )(classification, localization, anchors_t, annotations, ann_t)

    # ---- tiny finalization in the wrapper (per-batch divide + batch mean) ----
    cls_sum = jnp.sum(cls_part, axis=(1, 2, 3))                 # (B,)
    loc_sum = jnp.sum(loc_part, axis=(1, 2, 3))
    pos_num = jnp.sum(pos_part, axis=(1, 2, 3))
    has_anno = jnp.any(annotations[:, :, 0] != -1.0, axis=1)    # (B,)
    cls_b = jnp.where(has_anno, cls_sum / jnp.maximum(pos_num, 1.0), 0.0)
    loc_b = jnp.where(jnp.logical_and(has_anno, pos_num > 0.0),
                      loc_sum / jnp.maximum(pos_num * 4.0, 1.0), 0.0)
    return jnp.mean(cls_b).reshape(1), jnp.mean(loc_b).reshape(1)


# ---------------------------------------------------------------------------
# pure-numpy reference mirroring the PyTorch module (for correctness check)
# ---------------------------------------------------------------------------
def _focal_loss_ref(classification, localization, anchors, annotations,
                    alpha=0.25, gamma=2.0):
    classification = np.asarray(classification, np.float64)
    localization = np.asarray(localization, np.float64)
    anchors = np.asarray(anchors, np.float64)
    annotations = np.asarray(annotations, np.float64)
    B = classification.shape[0]
    cls_losses, loc_losses = [], []
    for i in range(B):
        pred_cls = classification[i]
        pred_loc = localization[i]
        anno = annotations[i]
        anno = anno[anno[:, 0] != -1]
        if anno.shape[0] == 0:
            cls_losses.append(0.0)
            loc_losses.append(0.0)
            continue
        pred_cls = np.clip(pred_cls, 0.0001, 1 - 0.0001)
        ax1, ay1, ax2, ay2 = (anchors[:, j:j + 1] for j in range(4))
        gb = anno[:, :4]
        iw = np.maximum(np.minimum(ax2, gb[:, 2][None]) - np.maximum(ax1, gb[:, 0][None]), 0.0)
        ih = np.maximum(np.minimum(ay2, gb[:, 3][None]) - np.maximum(ay1, gb[:, 1][None]), 0.0)
        inter = iw * ih
        area_a = (ax2 - ax1) * (ay2 - ay1)
        area_g = ((gb[:, 2] - gb[:, 0]) * (gb[:, 3] - gb[:, 1]))[None]
        union = np.maximum(area_a + area_g - inter, 1e-8)
        iou = inter / union
        iou_max = iou.max(axis=1)
        iou_arg = iou.argmax(axis=1)
        onehot = -np.ones_like(pred_cls)
        onehot[iou_max < 0.4, :] = 0
        pos = iou_max >= 0.5
        pos_num = pos.sum()
        gt = anno[iou_arg]
        onehot[pos, :] = 0
        onehot[pos, gt[pos, -1].astype(int)] = 1
        alpha_w = np.where(onehot == 1, alpha, 1 - alpha)
        pt = np.where(onehot == 1, pred_cls, 1 - pred_cls)
        fw = alpha_w * (1 - pt) ** gamma
        bce = -(onehot * np.log(pred_cls) + (1 - onehot) * np.log(1 - pred_cls))
        cls_loss = np.where(onehot == -1, 0.0, fw * bce)
        cls_losses.append(cls_loss.sum() / max(float(pos_num), 1.0))
        if pos_num <= 0:
            loc_losses.append(0.0)
        else:
            aw = anchors[:, 2] - anchors[:, 0]
            ah = anchors[:, 3] - anchors[:, 1]
            acx = anchors[:, 0] + 0.5 * aw
            acy = anchors[:, 1] + 0.5 * ah
            pw, ph, pcx, pcy = aw[pos], ah[pos], acx[pos], acy[pos]
            pgt = gt[pos]
            gw = pgt[:, 2] - pgt[:, 0]
            gh = pgt[:, 3] - pgt[:, 1]
            gcx = pgt[:, 0] + 0.5 * gw
            gcy = pgt[:, 1] + 0.5 * gh
            gw = np.maximum(gw, 1.0)
            gh = np.maximum(gh, 1.0)
            d = np.stack([(gcx - pcx) / pw, (gcy - pcy) / ph,
                          np.log(gw / pw), np.log(gh / ph)]).T
            d = d / np.array([[0.1, 0.1, 0.2, 0.2]])
            x = np.abs(d - pred_loc[pos])
            ll = np.where(x <= 1.0 / 9.0, 0.5 * 9.0 * x * x, x - 0.5 / 9.0)
            loc_losses.append(ll.mean())
    return (np.array([np.mean(cls_losses)]), np.array([np.mean(loc_losses)]))


if __name__ == "__main__":
    B, K, M = 2, 8, 8
    G = 17                       # 17x17 grid of 16-px anchors -> A = 289 (ragged tiles)
    A = G * G

    anchors_np = np.zeros((A, 4), np.float32)
    idx = 0
    for gy in range(G):
        for gx in range(G):
            anchors_np[idx] = [gx * 16.0, gy * 16.0,
                               gx * 16.0 + 16.0, gy * 16.0 + 16.0]
            idx += 1

    # annotations (B, M, 5); padded rows are all -1
    ann_np = -np.ones((B, M, 5), np.float32)
    ann_np[0, 0] = [*anchors_np[3], 1.0]                                   # exact match
    ann_np[0, 1] = [anchors_np[20][0] + 2.0, anchors_np[20][1] + 2.0,
                    anchors_np[20][2] + 2.0, anchors_np[20][3] + 2.0, 4.0]
    ann_np[0, 2] = [*anchors_np[40], 7.0]
    ann_np[1, 0] = [anchors_np[5][0] + 1.0, anchors_np[5][1] + 1.0,
                    anchors_np[5][2] + 1.0, anchors_np[5][3] + 1.0, 0.0]
    ann_np[1, 1] = [0.0, 0.0, 40.0, 40.0, 2.0]

    key = jax.random.PRNGKey(0)
    k1, k2 = jax.random.split(key)
    classification = jax.random.uniform(k1, (B, A, K), jnp.float32,
                                        minval=0.05, maxval=0.95)
    localization = jax.random.normal(k2, (B, A, 4), jnp.float32) * 0.1
    anchors = jnp.asarray(anchors_np)
    annotations = jnp.asarray(ann_np)

    # tile_a=128 with A=289 forces 3 anchor tiles including a ragged tail,
    # exercising the multi-tile + edge-masking paths.
    cls_loss, loc_loss = focal_loss(classification, localization, anchors,
                                    annotations, tile_a=128)
    cls_loss = jax.block_until_ready(cls_loss)
    loc_loss = jax.block_until_ready(loc_loss)

    cls_ref, loc_ref = _focal_loss_ref(np.asarray(classification),
                                       np.asarray(localization),
                                       anchors_np, ann_np)
    assert np.allclose(np.asarray(cls_loss), cls_ref, rtol=2e-3, atol=1e-5), \
        (cls_loss, cls_ref)
    assert np.allclose(np.asarray(loc_loss), loc_ref, rtol=2e-3, atol=1e-5), \
        (loc_loss, loc_ref)

    print("KERNEL_OK")
</pallas_src>

<mosaic_0001>
module attributes {stable_mosaic.version = 11 : i64} {
  func.func @_focal_loss_kernel(%arg0: i32, %arg1: i32, %arg2: memref<1x128x8xf32, #tpu.memory_space<vmem>>, %arg3: memref<1x128x4xf32, #tpu.memory_space<vmem>>, %arg4: memref<4x128xf32, #tpu.memory_space<vmem>>, %arg5: memref<1x8x5xf32, #tpu.memory_space<vmem>>, %arg6: memref<1x5x8xf32, #tpu.memory_space<vmem>>, %arg7: memref<1x1x1x1xf32, #tpu.memory_space<vmem>>, %arg8: memref<1x1x1x1xf32, #tpu.memory_space<vmem>>, %arg9: memref<1x1x1x1xf32, #tpu.memory_space<vmem>>) attributes {dimension_semantics = [#tpu.dimension_semantics<parallel>, #tpu.dimension_semantics<parallel>], iteration_bounds = array<i64: 2, 3>, scalar_prefetch = 0 : i64, scratch_operands = 0 : i64, tpu.core_type = #tpu.core_type<tc>, window_params = [{transform_indices = @transform_0, window_bounds = array<i64: 1, 128, 8>}, {transform_indices = @transform_1, window_bounds = array<i64: 1, 128, 4>}, {transform_indices = @transform_2, window_bounds = array<i64: 4, 128>}, {transform_indices = @transform_3, window_bounds = array<i64: 1, 8, 5>}, {transform_indices = @transform_4, window_bounds = array<i64: 1, 5, 8>}, {transform_indices = @transform_5, window_bounds = array<i64: 1, 1, 1, 1>}, {transform_indices = @transform_6, window_bounds = array<i64: 1, 1, 1, 1>}, {transform_indices = @transform_7, window_bounds = array<i64: 1, 1, 1, 1>}]} {
    %c0 = arith.constant 0 : index
    %c0_0 = arith.constant 0 : index
    %0 = vector.load %arg4[%c0, %c0_0] : memref<4x128xf32, #tpu.memory_space<vmem>>, vector<1x128xf32>
    %c1 = arith.constant 1 : index
    %c0_1 = arith.constant 0 : index
    %1 = vector.load %arg4[%c1, %c0_1] : memref<4x128xf32, #tpu.memory_space<vmem>>, vector<1x128xf32>
    %c2 = arith.constant 2 : index
    %c0_2 = arith.constant 0 : index
    %2 = vector.load %arg4[%c2, %c0_2] : memref<4x128xf32, #tpu.memory_space<vmem>>, vector<1x128xf32>
    %c3 = arith.constant 3 : index
    %c0_3 = arith.constant 0 : index
    %3 = vector.load %arg4[%c3, %c0_3] : memref<4x128xf32, #tpu.memory_space<vmem>>, vector<1x128xf32>
    %4 = arith.subf %2, %0 : vector<1x128xf32>
    %5 = arith.subf %3, %1 : vector<1x128xf32>
    %6 = arith.mulf %4, %5 : vector<1x128xf32>
    %cst = arith.constant 5.000000e-01 : f32
    %7 = vector.broadcast %cst : f32 to vector<1x128xf32>
    %8 = arith.mulf %7, %4 : vector<1x128xf32>
    %9 = arith.addf %0, %8 : vector<1x128xf32>
    %cst_4 = arith.constant 5.000000e-01 : f32
    %10 = vector.broadcast %cst_4 : f32 to vector<1x128xf32>
    %11 = arith.mulf %10, %5 : vector<1x128xf32>
    %12 = arith.addf %1, %11 : vector<1x128xf32>
    %cst_5 = arith.constant 1.000000e+00 : f32
    %13 = vector.broadcast %cst_5 : f32 to vector<1x128xf32>
    %14 = arith.divf %13, %4 : vector<1x128xf32>
    %cst_6 = arith.constant 1.000000e+00 : f32
    %15 = vector.broadcast %cst_6 : f32 to vector<1x128xf32>
    %16 = arith.divf %15, %5 : vector<1x128xf32>
    %c128_i32 = arith.constant 128 : i32
    %17 = arith.muli %arg1, %c128_i32 : i32
    %18 = tpu.iota {dimensions = array<i32: 1>} : vector<1x128xi32>
    %19 = vector.broadcast %17 : i32 to vector<1x128xi32>
    %20 = arith.addi %19, %18 : vector<1x128xi32>
    %c289_i32 = arith.constant 289 : i32
    %21 = vector.broadcast %c289_i32 : i32 to vector<1x128xi32>
    %22 = arith.cmpi slt, %20, %21 : vector<1x128xi32>
    %c0_7 = arith.constant 0 : index
    %c0_8 = arith.constant 0 : index
    %c0_9 = arith.constant 0 : index
    %23 = vector.load %arg5[%c0_7, %c0_8, %c0_9] : memref<1x8x5xf32, #tpu.memory_space<vmem>>, vector<1x8x5xf32>
    %24 = vector.shape_cast %23 : vector<1x8x5xf32> to vector<8x5xf32>
    %c0_10 = arith.constant 0 : index
    %c0_11 = arith.constant 0 : index
    %c0_12 = arith.constant 0 : index
    %25 = vector.load %arg6[%c0_10, %c0_11, %c0_12] : memref<1x5x8xf32, #tpu.memory_space<vmem>>, vector<1x5x8xf32>
    %26 = vector.shape_cast %25 : vector<1x5x8xf32> to vector<5x8xf32>
    %27 = vector.extract_strided_slice %24 {offsets = [0, 0], sizes = [8, 1], strides = [1, 1]} : vector<8x5xf32> to vector<8x1xf32>
    %28 = vector.extract_strided_slice %24 {offsets = [0, 1], sizes = [8, 1], strides = [1, 1]} : vector<8x5xf32> to vector<8x1xf32>
    %29 = vector.extract_strided_slice %24 {offsets = [0, 2], sizes = [8, 1], strides = [1, 1]} : vector<8x5xf32> to vector<8x1xf32>
    %30 = vector.extract_strided_slice %24 {offsets = [0, 3], sizes = [8, 1], strides = [1, 1]} : vector<8x5xf32> to vector<8x1xf32>
    %cst_13 = arith.constant -1.000000e+00 : f32
    %31 = vector.broadcast %cst_13 : f32 to vector<8x1xf32>
    %32 = arith.cmpf one, %27, %31 : vector<8x1xf32>
    %33 = vector.broadcast %2 : vector<1x128xf32> to vector<8x128xf32>
    %34 = vector.broadcast %29 : vector<8x1xf32> to vector<8x128xf32>
    %35 = arith.minimumf %33, %34 : vector<8x128xf32>
    %36 = vector.broadcast %0 : vector<1x128xf32> to vector<8x128xf32>
    %37 = vector.broadcast %27 : vector<8x1xf32> to vector<8x128xf32>
    %38 = arith.maximumf %36, %37 : vector<8x128xf32>
    %39 = arith.subf %35, %38 : vector<8x128xf32>
    %cst_14 = arith.constant 0.000000e+00 : f32
    %40 = vector.broadcast %cst_14 : f32 to vector<8x128xf32>
    %41 = arith.maximumf %39, %40 : vector<8x128xf32>
    %42 = vector.broadcast %3 : vector<1x128xf32> to vector<8x128xf32>
    %43 = vector.broadcast %30 : vector<8x1xf32> to vector<8x128xf32>
    %44 = arith.minimumf %42, %43 : vector<8x128xf32>
    %45 = vector.broadcast %1 : vector<1x128xf32> to vector<8x128xf32>
    %46 = vector.broadcast %28 : vector<8x1xf32> to vector<8x128xf32>
    %47 = arith.maximumf %45, %46 : vector<8x128xf32>
    %48 = arith.subf %44, %47 : vector<8x128xf32>
    %cst_15 = arith.constant 0.000000e+00 : f32
    %49 = vector.broadcast %cst_15 : f32 to vector<8x128xf32>
    %50 = arith.maximumf %48, %49 : vector<8x128xf32>
    %51 = arith.mulf %41, %50 : vector<8x128xf32>
    %52 = arith.subf %29, %27 : vector<8x1xf32>
    %53 = arith.subf %30, %28 : vector<8x1xf32>
    %54 = arith.mulf %52, %53 : vector<8x1xf32>
    %55 = vector.broadcast %6 : vector<1x128xf32> to vector<8x128xf32>
    %56 = vector.broadcast %54 : vector<8x1xf32> to vector<8x128xf32>
    %57 = arith.addf %55, %56 : vector<8x128xf32>
    %58 = arith.subf %57, %51 : vector<8x128xf32>
    %cst_16 = arith.constant 9.99999993E-9 : f32
    %59 = vector.broadcast %cst_16 : f32 to vector<8x128xf32>
    %60 = arith.maximumf %58, %59 : vector<8x128xf32>
    %61 = arith.divf %51, %60 : vector<8x128xf32>
    %cst_17 = arith.constant -1.000000e+00 : f32
    %62 = vector.shape_cast %32 : vector<8x1xi1> to vector<8x1xi1>
    %63 = vector.broadcast %62 : vector<8x1xi1> to vector<8x128xi1>
    %64 = vector.broadcast %cst_17 : f32 to vector<8x128xf32>
    %65 = arith.select %63, %61, %64 : vector<8x128xi1>, vector<8x128xf32>
    %cst_18 = arith.constant dense<0xFF800000> : vector<128xf32>
    %66 = vector.multi_reduction <maximumf>, %65, %cst_18 [0] : vector<8x128xf32> to vector<128xf32>
    %67 = vector.shape_cast %66 : vector<128xf32> to vector<1x128xf32>
    %68 = tpu.iota {dimensions = array<i32: 0>} : vector<8x128xi32>
    %69 = vector.broadcast %67 : vector<1x128xf32> to vector<8x128xf32>
    %70 = arith.cmpf oge, %65, %69 : vector<8x128xf32>
    %c8_i32 = arith.constant 8 : i32
    %71 = vector.broadcast %c8_i32 : i32 to vector<8x128xi32>
    %72 = arith.select %70, %68, %71 : vector<8x128xi1>, vector<8x128xi32>
    %cst_19 = arith.constant dense<2147483647> : vector<128xi32>
    %73 = vector.multi_reduction <minsi>, %72, %cst_19 [0] : vector<8x128xi32> to vector<128xi32>
    %74 = vector.shape_cast %73 : vector<128xi32> to vector<1x128xi32>
    %75 = vector.broadcast %74 : vector<1x128xi32> to vector<8x128xi32>
    %76 = arith.cmpi eq, %68, %75 : vector<8x128xi32>
    %77 = arith.extui %76 : vector<8x128xi1> to vector<8x128xi32>
    %78 = arith.sitofp %77 : vector<8x128xi32> to vector<8x128xf32>
    %cst_20 = arith.constant dense<0.000000e+00> : vector<5x128xf32>
    %79 = tpu.matmul %26, %78, %cst_20 {dimension_numbers = #tpu.dot_dimension_numbers<[1], [0], [0], [1], [0, 0, 1, 1], [], []>} : vector<5x8xf32>, vector<8x128xf32>, vector<5x128xf32> -> vector<5x128xf32>
    %cst_21 = arith.constant 5.000000e-01 : f32
    %80 = vector.broadcast %cst_21 : f32 to vector<1x128xf32>
    %81 = arith.cmpf oge, %67, %80 : vector<1x128xf32>
    %82 = arith.andi %81, %22 : vector<1x128xi1>
    %cst_22 = arith.constant 4.000000e-01 : f32
    %83 = vector.broadcast %cst_22 : f32 to vector<1x128xf32>
    %84 = arith.cmpf olt, %67, %83 : vector<1x128xf32>
    %85 = arith.ori %82, %84 : vector<1x128xi1>
    %86 = arith.andi %85, %22 : vector<1x128xi1>
    %87 = arith.extui %82 : vector<1x128xi1> to vector<1x128xi32>
    %88 = arith.sitofp %87 : vector<1x128xi32> to vector<1x128xf32>
    %c0_23 = arith.constant 0 : index
    %c0_24 = arith.constant 0 : index
    %c0_25 = arith.constant 0 : index
    %89 = vector.load %arg2[%c0_23, %c0_24, %c0_25] : memref<1x128x8xf32, #tpu.memory_space<vmem>>, vector<1x128x8xf32>
    %90 = vector.shape_cast %89 : vector<1x128x8xf32> to vector<128x8xf32>
    %91 = tpu.iota {dimensions = array<i32: 0>} : vector<8x8xi32>
    %92 = tpu.iota {dimensions = array<i32: 1>} : vector<8x8xi32>
    %93 = arith.cmpi eq, %91, %92 : vector<8x8xi32>
    %94 = arith.extui %93 : vector<8x8xi1> to vector<8x8xi32>
    %95 = arith.sitofp %94 : vector<8x8xi32> to vector<8x8xf32>
    %cst_26 = arith.constant dense<0.000000e+00> : vector<8x128xf32>
    %96 = tpu.matmul %95, %90, %cst_26 {dimension_numbers = #tpu.dot_dimension_numbers<[1], [1], [0], [0], [0, 0, 1, 0], [], []>} : vector<8x8xf32>, vector<128x8xf32>, vector<8x128xf32> -> vector<8x128xf32>
    %cst_27 = arith.constant 9.99999974E-5 : f32
    %cst_28 = arith.constant 0.999899983 : f32
    %97 = vector.broadcast %cst_27 : f32 to vector<8x128xf32>
    %98 = arith.maximumf %97, %96 : vector<8x128xf32>
    %99 = vector.broadcast %cst_28 : f32 to vector<8x128xf32>
    %100 = arith.minimumf %99, %98 : vector<8x128xf32>
    %101 = vector.extract_strided_slice %79 {offsets = [4, 0], sizes = [1, 128], strides = [1, 1]} : vector<5x128xf32> to vector<1x128xf32>
    %102 = arith.fptosi %101 : vector<1x128xf32> to vector<1x128xi32>
    %103 = tpu.iota {dimensions = array<i32: 0>} : vector<8x128xi32>
    %104 = vector.broadcast %102 : vector<1x128xi32> to vector<8x128xi32>
    %105 = arith.cmpi eq, %103, %104 : vector<8x128xi32>
    %106 = vector.broadcast %82 : vector<1x128xi1> to vector<8x128xi1>
    %107 = arith.andi %106, %105 : vector<8x128xi1>
    %cst_29 = arith.constant 2.500000e-01 : f32
    %cst_30 = arith.constant 7.500000e-01 : f32
    %108 = vector.broadcast %cst_29 : f32 to vector<8x128xf32>
    %109 = vector.broadcast %cst_30 : f32 to vector<8x128xf32>
    %110 = arith.select %107, %108, %109 : vector<8x128xi1>, vector<8x128xf32>
    %cst_31 = arith.constant 1.000000e+00 : f32
    %111 = vector.broadcast %cst_31 : f32 to vector<8x128xf32>
    %112 = arith.subf %111, %100 : vector<8x128xf32>
    %113 = arith.select %107, %100, %112 : vector<8x128xi1>, vector<8x128xf32>
    %cst_32 = arith.constant 1.000000e+00 : f32
    %114 = vector.broadcast %cst_32 : f32 to vector<8x128xf32>
    %115 = arith.subf %114, %113 : vector<8x128xf32>
    %116 = arith.mulf %115, %115 : vector<8x128xf32>
    %117 = arith.mulf %110, %116 : vector<8x128xf32>
    %118 = math.log %113 : vector<8x128xf32>
    %cst_33 = arith.constant 0.000000e+00 : f32
    %119 = vector.broadcast %cst_33 : f32 to vector<8x128xf32>
    %120 = arith.subf %119, %118 : vector<8x128xf32>
    %121 = arith.mulf %117, %120 : vector<8x128xf32>
    %cst_34 = arith.constant 0.000000e+00 : f32
    %122 = vector.shape_cast %86 : vector<1x128xi1> to vector<1x128xi1>
    %123 = vector.broadcast %122 : vector<1x128xi1> to vector<8x128xi1>
    %124 = vector.broadcast %cst_34 : f32 to vector<8x128xf32>
    %125 = arith.select %123, %121, %124 : vector<8x128xi1>, vector<8x128xf32>
    %cst_35 = arith.constant dense<0.000000e+00> : vector<128xf32>
    %126 = vector.multi_reduction <add>, %125, %cst_35 [0] : vector<8x128xf32> to vector<128xf32>
    %127 = vector.shape_cast %126 : vector<128xf32> to vector<1x128xf32>
    %cst_36 = arith.constant dense<0.000000e+00> : vector<1xf32>
    %128 = vector.multi_reduction <add>, %127, %cst_36 [1] : vector<1x128xf32> to vector<1xf32>
    %129 = vector.shape_cast %128 : vector<1xf32> to vector<1x1xf32>
    %c0_37 = arith.constant 0 : index
    %c0_38 = arith.constant 0 : index
    %c0_39 = arith.constant 0 : index
    %130 = vector.load %arg3[%c0_37, %c0_38, %c0_39] : memref<1x128x4xf32, #tpu.memory_space<vmem>>, vector<1x128x4xf32>
    %131 = vector.shape_cast %130 : vector<1x128x4xf32> to vector<128x4xf32>
    %132 = tpu.iota {dimensions = array<i32: 0>} : vector<8x4xi32>
    %133 = tpu.iota {dimensions = array<i32: 1>} : vector<8x4xi32>
    %134 = arith.cmpi eq, %132, %133 : vector<8x4xi32>
    %135 = arith.extui %134 : vector<8x4xi1> to vector<8x4xi32>
    %136 = arith.sitofp %135 : vector<8x4xi32> to vector<8x4xf32>
    %cst_40 = arith.constant dense<0.000000e+00> : vector<8x128xf32>
    %137 = tpu.matmul %136, %131, %cst_40 {dimension_numbers = #tpu.dot_dimension_numbers<[1], [1], [0], [0], [0, 0, 1, 0], [], []>} : vector<8x4xf32>, vector<128x4xf32>, vector<8x128xf32> -> vector<8x128xf32>
    %138 = vector.extract_strided_slice %137 {offsets = [0, 0], sizes = [4, 128], strides = [1, 1]} : vector<8x128xf32> to vector<4x128xf32>
    %139 = vector.extract_strided_slice %79 {offsets = [0, 0], sizes = [1, 128], strides = [1, 1]} : vector<5x128xf32> to vector<1x128xf32>
    %140 = vector.extract_strided_slice %79 {offsets = [1, 0], sizes = [1, 128], strides = [1, 1]} : vector<5x128xf32> to vector<1x128xf32>
    %141 = vector.extract_strided_slice %79 {offsets = [2, 0], sizes = [1, 128], strides = [1, 1]} : vector<5x128xf32> to vector<1x128xf32>
    %142 = vector.extract_strided_slice %79 {offsets = [3, 0], sizes = [1, 128], strides = [1, 1]} : vector<5x128xf32> to vector<1x128xf32>
    %143 = arith.subf %141, %139 : vector<1x128xf32>
    %144 = arith.subf %142, %140 : vector<1x128xf32>
    %cst_41 = arith.constant 5.000000e-01 : f32
    %145 = vector.broadcast %cst_41 : f32 to vector<1x128xf32>
    %146 = arith.mulf %145, %143 : vector<1x128xf32>
    %147 = arith.addf %139, %146 : vector<1x128xf32>
    %cst_42 = arith.constant 5.000000e-01 : f32
    %148 = vector.broadcast %cst_42 : f32 to vector<1x128xf32>
    %149 = arith.mulf %148, %144 : vector<1x128xf32>
    %150 = arith.addf %140, %149 : vector<1x128xf32>
    %cst_43 = arith.constant 1.000000e+00 : f32
    %151 = vector.broadcast %cst_43 : f32 to vector<1x128xf32>
    %152 = arith.maximumf %143, %151 : vector<1x128xf32>
    %cst_44 = arith.constant 1.000000e+00 : f32
    %153 = vector.broadcast %cst_44 : f32 to vector<1x128xf32>
    %154 = arith.maximumf %144, %153 : vector<1x128xf32>
    %155 = arith.subf %147, %9 : vector<1x128xf32>
    %156 = arith.mulf %155, %14 : vector<1x128xf32>
    %cst_45 = arith.constant 1.000000e+01 : f32
    %157 = vector.broadcast %cst_45 : f32 to vector<1x128xf32>
    %158 = arith.mulf %156, %157 : vector<1x128xf32>
    %159 = arith.subf %150, %12 : vector<1x128xf32>
    %160 = arith.mulf %159, %16 : vector<1x128xf32>
    %cst_46 = arith.constant 1.000000e+01 : f32
    %161 = vector.broadcast %cst_46 : f32 to vector<1x128xf32>
    %162 = arith.mulf %160, %161 : vector<1x128xf32>
    %163 = arith.mulf %152, %14 : vector<1x128xf32>
    %164 = math.log %163 : vector<1x128xf32>
    %cst_47 = arith.constant 5.000000e+00 : f32
    %165 = vector.broadcast %cst_47 : f32 to vector<1x128xf32>
    %166 = arith.mulf %164, %165 : vector<1x128xf32>
    %167 = arith.mulf %154, %16 : vector<1x128xf32>
    %168 = math.log %167 : vector<1x128xf32>
    %cst_48 = arith.constant 5.000000e+00 : f32
    %169 = vector.broadcast %cst_48 : f32 to vector<1x128xf32>
    %170 = arith.mulf %168, %169 : vector<1x128xf32>
    %171 = vector.extract_strided_slice %138 {offsets = [0, 0], sizes = [1, 128], strides = [1, 1]} : vector<4x128xf32> to vector<1x128xf32>
    %172 = arith.subf %158, %171 : vector<1x128xf32>
    %173 = math.absf %172 : vector<1x128xf32>
    %cst_49 = arith.constant 0.111111112 : f32
    %174 = vector.broadcast %cst_49 : f32 to vector<1x128xf32>
    %175 = arith.cmpf ole, %173, %174 : vector<1x128xf32>
    %cst_50 = arith.constant 4.500000e+00 : f32
    %176 = vector.broadcast %cst_50 : f32 to vector<1x128xf32>
    %177 = arith.mulf %176, %173 : vector<1x128xf32>
    %178 = arith.mulf %177, %173 : vector<1x128xf32>
    %cst_51 = arith.constant 0.055555556 : f32
    %179 = vector.broadcast %cst_51 : f32 to vector<1x128xf32>
    %180 = arith.subf %173, %179 : vector<1x128xf32>
    %181 = arith.select %175, %178, %180 : vector<1x128xi1>, vector<1x128xf32>
    %182 = vector.extract_strided_slice %138 {offsets = [1, 0], sizes = [1, 128], strides = [1, 1]} : vector<4x128xf32> to vector<1x128xf32>
    %183 = arith.subf %162, %182 : vector<1x128xf32>
    %184 = math.absf %183 : vector<1x128xf32>
    %cst_52 = arith.constant 0.111111112 : f32
    %185 = vector.broadcast %cst_52 : f32 to vector<1x128xf32>
    %186 = arith.cmpf ole, %184, %185 : vector<1x128xf32>
    %cst_53 = arith.constant 4.500000e+00 : f32
    %187 = vector.broadcast %cst_53 : f32 to vector<1x128xf32>
    %188 = arith.mulf %187, %184 : vector<1x128xf32>
    %189 = arith.mulf %188, %184 : vector<1x128xf32>
    %cst_54 = arith.constant 0.055555556 : f32
    %190 = vector.broadcast %cst_54 : f32 to vector<1x128xf32>
    %191 = arith.subf %184, %190 : vector<1x128xf32>
    %192 = arith.select %186, %189, %191 : vector<1x128xi1>, vector<1x128xf32>
    %193 = arith.addf %181, %192 : vector<1x128xf32>
    %194 = vector.extract_strided_slice %138 {offsets = [2, 0], sizes = [1, 128], strides = [1, 1]} : vector<4x128xf32> to vector<1x128xf32>
    %195 = arith.subf %166, %194 : vector<1x128xf32>
    %196 = math.absf %195 : vector<1x128xf32>
    %cst_55 = arith.constant 0.111111112 : f32
    %197 = vector.broadcast %cst_55 : f32 to vector<1x128xf32>
    %198 = arith.cmpf ole, %196, %197 : vector<1x128xf32>
    %cst_56 = arith.constant 4.500000e+00 : f32
    %199 = vector.broadcast %cst_56 : f32 to vector<1x128xf32>
    %200 = arith.mulf %199, %196 : vector<1x128xf32>
    %201 = arith.mulf %200, %196 : vector<1x128xf32>
    %cst_57 = arith.constant 0.055555556 : f32
    %202 = vector.broadcast %cst_57 : f32 to vector<1x128xf32>
    %203 = arith.subf %196, %202 : vector<1x128xf32>
    %204 = arith.select %198, %201, %203 : vector<1x128xi1>, vector<1x128xf32>
    %205 = arith.addf %193, %204 : vector<1x128xf32>
    %206 = vector.extract_strided_slice %138 {offsets = [3, 0], sizes = [1, 128], strides = [1, 1]} : vector<4x128xf32> to vector<1x128xf32>
    %207 = arith.subf %170, %206 : vector<1x128xf32>
    %208 = math.absf %207 : vector<1x128xf32>
    %cst_58 = arith.constant 0.111111112 : f32
    %209 = vector.broadcast %cst_58 : f32 to vector<1x128xf32>
    %210 = arith.cmpf ole, %208, %209 : vector<1x128xf32>
    %cst_59 = arith.constant 4.500000e+00 : f32
    %211 = vector.broadcast %cst_59 : f32 to vector<1x128xf32>
    %212 = arith.mulf %211, %208 : vector<1x128xf32>
    %213 = arith.mulf %212, %208 : vector<1x128xf32>
    %cst_60 = arith.constant 0.055555556 : f32
    %214 = vector.broadcast %cst_60 : f32 to vector<1x128xf32>
    %215 = arith.subf %208, %214 : vector<1x128xf32>
    %216 = arith.select %210, %213, %215 : vector<1x128xi1>, vector<1x128xf32>
    %217 = arith.addf %205, %216 : vector<1x128xf32>
    %cst_61 = arith.constant 0.000000e+00 : f32
    %218 = vector.broadcast %cst_61 : f32 to vector<1x128xf32>
    %219 = arith.select %82, %217, %218 : vector<1x128xi1>, vector<1x128xf32>
    %cst_62 = arith.constant dense<0.000000e+00> : vector<1xf32>
    %220 = vector.multi_reduction <add>, %219, %cst_62 [1] : vector<1x128xf32> to vector<1xf32>
    %221 = vector.shape_cast %220 : vector<1xf32> to vector<1x1xf32>
    %cst_63 = arith.constant dense<0.000000e+00> : vector<1xf32>
    %222 = vector.multi_reduction <add>, %88, %cst_63 [1] : vector<1x128xf32> to vector<1xf32>
    %223 = vector.shape_cast %222 : vector<1xf32> to vector<1x1xf32>
    %c0_64 = arith.constant 0 : index
    %c0_65 = arith.constant 0 : index
    %c0_66 = arith.constant 0 : index
    %c0_67 = arith.constant 0 : index
    %224 = vector.load %arg7[%c0_64, %c0_65, %c0_66, %c0_67] : memref<1x1x1x1xf32, #tpu.memory_space<vmem>>, vector<1x1x1x1xf32>
    %225 = vector.shape_cast %224 : vector<1x1x1x1xf32> to vector<1x1xf32>
    %226 = vector.shape_cast %129 : vector<1x1xf32> to vector<1x1x1x1xf32>
    tpu.vector_store %arg7[%c0_64, %c0_65, %c0_66, %c0_67], %226 {strides = array<i32>} : memref<1x1x1x1xf32, #tpu.memory_space<vmem>>, vector<1x1x1x1xf32>,
    %c0_68 = arith.constant 0 : index
    %c0_69 = arith.constant 0 : index
    %c0_70 = arith.constant 0 : index
    %c0_71 = arith.constant 0 : index
    %227 = vector.load %arg8[%c0_68, %c0_69, %c0_70, %c0_71] : memref<1x1x1x1xf32, #tpu.memory_space<vmem>>, vector<1x1x1x1xf32>
    %228 = vector.shape_cast %227 : vector<1x1x1x1xf32> to vector<1x1xf32>
    %229 = vector.shape_cast %221 : vector<1x1xf32> to vector<1x1x1x1xf32>
    tpu.vector_store %arg8[%c0_68, %c0_69, %c0_70, %c0_71], %229 {strides = array<i32>} : memref<1x1x1x1xf32, #tpu.memory_space<vmem>>, vector<1x1x1x1xf32>,
    %c0_72 = arith.constant 0 : index
    %c0_73 = arith.constant 0 : index
    %c0_74 = arith.constant 0 : index
    %c0_75 = arith.constant 0 : index
    %230 = vector.load %arg9[%c0_72, %c0_73, %c0_74, %c0_75] : memref<1x1x1x1xf32, #tpu.memory_space<vmem>>, vector<1x1x1x1xf32>
    %231 = vector.shape_cast %230 : vector<1x1x1x1xf32> to vector<1x1xf32>
    %232 = vector.shape_cast %223 : vector<1x1xf32> to vector<1x1x1x1xf32>
    tpu.vector_store %arg9[%c0_72, %c0_73, %c0_74, %c0_75], %232 {strides = array<i32>} : memref<1x1x1x1xf32, #tpu.memory_space<vmem>>, vector<1x1x1x1xf32>,
    return
  }
  func.func @transform_0(%arg0: i32, %arg1: i32) -> (i32, i32, i32) {
    %c0_i32 = arith.constant 0 : i32
    %c0_i32_0 = arith.constant 0 : i32
    return %arg0, %arg1, %c0_i32 : i32, i32, i32
  }
  func.func @transform_1(%arg0: i32, %arg1: i32) -> (i32, i32, i32) {
    %c0_i32 = arith.constant 0 : i32
    %c0_i32_0 = arith.constant 0 : i32
    return %arg0, %arg1, %c0_i32 : i32, i32, i32
  }
  func.func @transform_2(%arg0: i32, %arg1: i32) -> (i32, i32) {
    %c0_i32 = arith.constant 0 : i32
    %c0_i32_0 = arith.constant 0 : i32
    return %c0_i32, %arg1 : i32, i32
  }
  func.func @transform_3(%arg0: i32, %arg1: i32) -> (i32, i32, i32) {
    %c0_i32 = arith.constant 0 : i32
    %c0_i32_0 = arith.constant 0 : i32
    %c0_i32_1 = arith.constant 0 : i32
    return %arg0, %c0_i32, %c0_i32_0 : i32, i32, i32
  }
  func.func @transform_4(%arg0: i32, %arg1: i32) -> (i32, i32, i32) {
    %c0_i32 = arith.constant 0 : i32
    %c0_i32_0 = arith.constant 0 : i32
    %c0_i32_1 = arith.constant 0 : i32
    return %arg0, %c0_i32, %c0_i32_0 : i32, i32, i32
  }
  func.func @transform_5(%arg0: i32, %arg1: i32) -> (i32, i32, i32, i32) {
    %c0_i32 = arith.constant 0 : i32
    %c0_i32_0 = arith.constant 0 : i32
    %c0_i32_1 = arith.constant 0 : i32
    return %arg0, %arg1, %c0_i32, %c0_i32_0 : i32, i32, i32, i32
  }
  func.func @transform_6(%arg0: i32, %arg1: i32) -> (i32, i32, i32, i32) {
    %c0_i32 = arith.constant 0 : i32
    %c0_i32_0 = arith.constant 0 : i32
    %c0_i32_1 = arith.constant 0 : i32
    return %arg0, %arg1, %c0_i32, %c0_i32_0 : i32, i32, i32, i32
  }
  func.func @transform_7(%arg0: i32, %arg1: i32) -> (i32, i32, i32, i32) {
    %c0_i32 = arith.constant 0 : i32
    %c0_i32_0 = arith.constant 0 : i32
    %c0_i32_1 = arith.constant 0 : i32
    return %arg0, %arg1, %c0_i32, %c0_i32_0 : i32, i32, i32, i32
  }
}

</mosaic_0001>

<bundles_post_ra>
// kernel: tpu_custom_call.1
= control target key start
LH: loop header
LB: loop body
LE: loop exit
PB: predicated region body
PF: predicated region fallthrough
CT: control target
= control target key end

     0   :  { %s1682_s24 = smov 0   ;;  %s1684_s25 = smov 0   ;;  %s1948_s0 = inlined_call_operand.vmem [shape: f32[2,289,8], index: 0, kind: input, shape index: {}]   ;;  %s1949_s1 = inlined_call_operand.vmem [shape: f32[2,289,4], index: 1, kind: input, shape index: {}]   ;;  %s1950_s2 = inlined_call_operand.vmem [shape: f32[4,289], index: 2, kind: input, shape index: {}]   ;;  %s1951_s3 = inlined_call_operand.vmem [shape: f32[2,8,5], index: 3, kind: input, shape index: {}]   ;;  %s1952_s4 = inlined_call_operand.vmem [shape: f32[2,5,8], index: 4, kind: input, shape index: {}]   ;;  %s1953_s5 = inlined_call_operand.vmem [shape: f32[2,3,1,1], index: 5, kind: output, shape index: {0}]   ;;  %s1954_s6 = inlined_call_operand.vmem [shape: f32[2,3,1,1], index: 6, kind: output, shape index: {1}]   ;;  %s1955_s7 = inlined_call_operand.vmem [shape: f32[2,3,1,1], index: 7, kind: output, shape index: {2}]  }
   0x1   :  { %s1686_s26 = smov 0   ;;  %s1688_s27 = smov 0  }
   0x2   :  { %s1690_s28 = smov 0  }
   0x3 LB: > { %s27_s29 = sadd.s32 1, %s1621_s26  ;;  %s30_s30 = sadd.s32 1, %s1625_s27  ;;  %s1629_s28 = sphi %s1690_s28, %s18_s28   ;;  %s1625_s27 = sphi %s1688_s27, %s1967_s27   ;;  %s1621_s26 = sphi %s1686_s26, %s1966_s26   ;;  %s1617_s25 = sphi %s1684_s25, %s1965_s25   ;;  %s1613_s24 = sphi %s1682_s24, %s1964_s24  }
   0x4   : > { %p28_p0 = scmp.ge.s32.totalorder %s27_s29, 3  ;;  %p1289_p1 = scmp.ge.s32.totalorder %s1629_s28, 1 }
   0x5   : > { %p327_p2 = scmp.lt.s32.totalorder %s1629_s28, 7 }
   0x6   : > { %s1969_s29 = smov (%p28_p0, %s27_s29), 0  ;;  %s1971_s30 = smov (!%p28_p0, %s30_s30), %s1625_s27 }
   0x7   : > { %p328_p3 = pnand %p1289_p1, %p327_p2  ;;  %p32_p4 = scmp.ge.s32.totalorder %s1971_s30, 2 }
   0x8   : > { %p413_p5 = scmp.lt.s32.totalorder (!%p328_p3), %s1617_s25, 1  ;;  %v1631_v0 = vmov (!%p328_p3), 2   ;;  %v1632_v1 = vmov (!%p328_p3), 3   ;;  %s1633_s12 = smov (!%p328_p3), 2   ;;  %v1634_v3 = vmov (!%p328_p3), 0   ;;  %v1635_v4 = vmov (!%p328_p3), 1  }
   0x9   : > { %s1973_s30 = smov (%p32_p4, %s1971_s30), 0  ;;  %331 = sbr.rel (%p328_p3) target bundleno = 873 (0x369), region = 40 }
   0xa   : > { %1573 = vset.pattern.permute.xlu1 (!%p328_p3), %v1631_v0  ;;  %1575 = vset.pattern.permute.xlu0 (!%p328_p3), %v1632_v1  ;;  %s1290_s13 = sshll.u32 (!%p328_p3), %s1613_s24, 4  ;;  %p444_p6 = scmp.lt.s32.totalorder (!%p328_p3), %s1613_s24, 2  ;;  %vm594_vm1 = vcmask (!%p328_p3), 64512   ;;  %v1637_v15 = vmov (!%p328_p3), 0.0|0.0   ;;  %v1638_v38 = vmov (!%p328_p3), 0.0   ;;  %v493_v42 = vlaneseq (!%p328_p3) }
   0xb   : > { %p415_p7 = scmp.lt.s32.totalorder (!%p328_p3), %s1290_s13, 36  ;;  %s1636_s21 = smov (!%p328_p3), 127   ;;  %1454 = vmatprep.subr.bf16.mxu1 (!%p328_p3), %v1637_v15  ;;  %vm1763_vm2 = vmpackc.low (!%p328_p3), %vm594_vm1, %vm594_vm1  ;;  %1379 = vmatprep.subr.mxu0 (!%p328_p3), %v1638_v38  ;;  %vm1639_vm3 = vmmov (!%p328_p3), 0  }
   0xc   : > { %v1805_v43 = vshrl.u32 (!%p328_p3), %v493_v42, 7  ;;  %v494_v44 = vand.u32 (!%p328_p3), 127, %v493_v42  ;;  %1381 = vmatprep.mubr.msk.f32.mxu0 (!%p328_p3), %vm1639_vm3, %v1638_v38  ;;  %1416 = vmatprep.mubr.msk.f32.mxu1 (!%p328_p3), %vm1639_vm3, %v1638_v38 }
   0xe   : > { %vm691_vm4 = vcmp.eq.s32.totalorder (!%p328_p3), %v1805_v43, %v494_v44  ;;  %v503_v48 = vsub.s32 (!%p328_p3), 0, %v1805_v43 }
   0xf   : > { %v1813_v45 = vsel (!%p328_p3), %vm691_vm4, 1.0, %v1638_v38 }
  0x10   : > { %s1975_s25 = smov (!%p413_p5, %s1617_s25), 1  ;;  %s1977_s13 = smov (!%p415_p7, %s1290_s13), 36 }
  0x11   : > { %s1295_s8 = sshll.u32 %s1975_s25, 3  ;;  %s1518_s16 = smul.u32 37, %s1975_s25 }
  0x12   : > { %s451_s11 = scalar_lea.vmem %s1951_s3, %s1295_s8 }
  0x13   : > { %v498_v2 = vld [vmem:[%s451_s11] sm:$0xff]  ;;  %s1725_s14 = scalar_select %p444_p6, %s1613_s24, 2 }
  0x14   : > { %543 = vrot.lane.b32.xlu0 %v498_v2, %s1633_s12  ;;  %507 = vperm.xlu1 %1573, %v498_v2   ;;  %s1745_s20 = sadd.s32 %s1518_s16, %s1977_s13  ;;  %vm500_vm0 = vcmp.ne.f32.partialorder %v498_v2, -1.0  ;;  %s1297_s11 = sshll.u32 %s1613_s24, 7 }
  0x15   : > { %s1294_s15 = sshll.u32 %s1725_s14, 2  ;;  %s1291_s22 = sshll.u32 %s1745_s20, 3  ;;  %v566_v12 = vsel %vm500_vm0, 1, %v1634_v3 }
  0x16   : > { %s1732_s19 = scalar_lea.vmem %s1950_s2, %s1294_s15  ;;  %s1756_s10 = scalar_lea.vmem %s1948_s0, %s1291_s22 }
  0x17   : > { %v1735_v5 = vld [vmem:[%s1732_s19] sm:$0x1]  ;;  %v1738_v6 = vld [vmem:[%s1732_s19 + $0x2] sm:$0x1]  ;;  %v676_v14 = vld [vmem:[%s1756_s10 + $0x8] sm:$0xff]  ;;  %s455_s13 = scalar_lea.vmem %s1952_s4, %s1295_s8  ;;  %s1852_s17 = scalar_lea.vmem %s1949_s1, %s1291_s22 }
  0x18   : > { %1574 = vset.pattern.permute.xlu1 %v1634_v3  ;;  %v1742_v7 = vsub.f32 %v1738_v6, %v1735_v5  ;;  %v675_v13 = vld [vmem:[%s1756_s10] sm:$0xff]  ;;  %v677_v18 = vld [vmem:[%s1756_s10 + $0x10] sm:$0xff]  ;;  %v678_v19 = vld [vmem:[%s1756_s10 + $0x18] sm:$0xff]  ;;  %v504_v51 = vrot.slane %v1738_v6, %v503_v48  ;;  %v514_v52 = vrot.slane %v1735_v5, %v503_v48  ;;  %s1519_s8 = smul.u32 3, %s1975_s25 }
  0x19   : > { %516 = vperm.xlu1 %1574, %v498_v2   ;;  %v1455_v16 = vpack.c.bf16 %v676_v14, %v675_v13  ;;  %v1459_v20 = vpack.c.bf16 %v678_v19, %v677_v18  ;;  %v679_v23 = vld [vmem:[%s1756_s10 + $0x20] sm:$0xff]  ;;  %v680_v24 = vld [vmem:[%s1756_s10 + $0x28] sm:$0xff]  ;;  %v681_v26 = vld [vmem:[%s1756_s10 + $0x30] sm:$0xff]  ;;  %v495_v18 = vstv %s1297_s11 }
  0x1a   : > { %v484_v10 = vmul.f32 0.5, %v1742_v7  ;;  %v1463_v25 = vpack.c.bf16 %v680_v24, %v679_v23  ;;  %v682_v27 = vld [vmem:[%s1756_s10 + $0x38] sm:$0xff]  ;;  %v683_v29 = vld [vmem:[%s1756_s10 + $0x40] sm:$0xff]  ;;  %v684_v30 = vld [vmem:[%s1756_s10 + $0x48] sm:$0xff]  ;;  %s461_s18 = sadd.s32 %s1519_s8, %s1725_s14 }
  0x1b   : > { %1457 = vmatpush3.bf16.xpose.msk.msra.mxu1 %vm1763_vm2, %v1455_v16  ;;  %v1467_v28 = vpack.c.bf16 %v682_v27, %v681_v26  ;;  %v1471_v31 = vpack.c.bf16 %v684_v30, %v683_v29  ;;  %v685_v32 = vld [vmem:[%s1756_s10 + $0x50] sm:$0xff]  ;;  %v686_v33 = vld [vmem:[%s1756_s10 + $0x58] sm:$0xff]  ;;  %v687_v35 = vld [vmem:[%s1756_s10 + $0x60] sm:$0xff]  ;;  %s476_s9 = scalar_lea.vmem %s1955_s7, %s461_s18  ;;  %s469_s24 = scalar_lea.vmem %s1954_s6, %s461_s18 }
  0x1c   : > { %v1748_v11 = vadd.f32 %v484_v10, %v1735_v5  ;;  %1458 = vmatprep.subr.bf16.mxu1 %v1637_v15  ;;  %v1475_v34 = vpack.c.bf16 %v686_v33, %v685_v32  ;;  %v688_v36 = vld [vmem:[%s1756_s10 + $0x68] sm:$0xff]  ;;  %v689_v39 = vld [vmem:[%s1756_s10 + $0x70] sm:$0xff]  ;;  %v690_v40 = vld [vmem:[%s1756_s10 + $0x78] sm:$0xff] }
  0x1d   : > { %1576 = vset.pattern.permute.xlu1 %v1635_v4  ;;  %v1479_v37 = vpack.c.bf16 %v688_v36, %v687_v35  ;;  %v1483_v41 = vpack.c.bf16 %v690_v40, %v689_v39  ;;  %v1819_v49 = vld [vmem:[%s1732_s19 + $0x1] sm:$0x1]  ;;  %v480_v50 = vld [vmem:[%s1732_s19 + $0x3] sm:$0x1]  ;;  %v847_v36 = vld [vmem:[%s1852_s17 + $0x8] sm:$0xff] }
  0x1e   : > { %536 = vperm.xlu1 %1576, %v498_v2   ;;  %v534_v53 = vrot.slane %v1819_v49, %v503_v48  ;;  %v525_v54 = vrot.slane %v480_v50, %v503_v48  ;;  %v1826_v57 = vsub.f32 %v480_v50, %v1819_v49  ;;  %v499_v33 = vld [vmem:[%s455_s13] sm:$0x1f]  ;;  %v848_v40 = vld [vmem:[%s1852_s17 + $0x10] sm:$0xff]  ;;  %v853_v50 = vld [vmem:[%s1852_s17 + $0x38] sm:$0xff] }
  0x1f   : > { %v846_v35 = vld [vmem:[%s1852_s17] sm:$0xff] }
  0x22   : > { %1577 = vset.pattern.permute.xlu1 %v1631_v0  ;;  %v483_v0 = vmul.f32 %v1826_v57, %v1742_v7 }
  0x23   : > { %1461 = vmatpush3.bf16.xpose.msk.msra.mxu1 %vm1763_vm2, %v1459_v20 }
  0x24   : > { %1462 = vmatprep.subr.bf16.mxu1 %v1637_v15 }
  0x2b   : > { %1465 = vmatpush3.bf16.xpose.msk.msra.mxu1 %vm1763_vm2, %v1463_v25 }
  0x2c   : > { %1466 = vmatprep.subr.bf16.mxu1 %v1637_v15 }
  0x33   : > { %1469 = vmatpush3.bf16.xpose.msk.msra.mxu1 %vm1763_vm2, %v1467_v28 }
  0x34   : > { %1470 = vmatprep.subr.bf16.mxu1 %v1637_v15 }
  0x3b   : > { %1473 = vmatpush3.bf16.xpose.msk.msra.mxu1 %vm1763_vm2, %v1471_v31 }
  0x3c   : > { %1474 = vmatprep.subr.bf16.mxu1 %v1637_v15 }
  0x43   : > { %1477 = vmatpush3.bf16.xpose.msk.msra.mxu1 %vm1763_vm2, %v1475_v34  ;;  %v1640_v34 = vmov 1.0  }
  0x44   : > { %1478 = vmatprep.subr.bf16.mxu1 %v1637_v15 }
  0x4b   : > { %1481 = vmatpush3.bf16.xpose.msk.msra.mxu1 %vm1763_vm2, %v1479_v37  ;;  %v1487_v37 = vpack.c.bf16 %v847_v36, %v846_v35 }
  0x4c   : > { %1482 = vmatprep.subr.bf16.mxu1 %v1637_v15 }
  0x53   : > { %1485 = vmatpush3.bf16.xpose.msk.msra.mxu1 %vm1763_vm2, %v1483_v41  ;;  %vm862_vm2 = vcmask 31744   ;;  %v849_v41 = vld [vmem:[%s1852_s17 + $0x18] sm:$0xff] }
  0x54   : > { %vm1863_vm4 = vmpackc.low %vm862_vm2, %vm862_vm2  ;;  %v1491_v42 = vpack.c.bf16 %v849_v41, %v848_v40 }
  0x5a   : > { %1417 = vmatmul.mubr.msk.f32.vlgmr.msra.gmra.mrb[0].mxu1 %vm594_vm1, %v1813_v45 }
  0x86   : > { %v544_v8 = vpop.permute.xlu0 %543 }
  0x87   : > { %v546_v9 = vsub.f32 %v498_v2, %v544_v8 }
  0x89   : > { %548 = vrot.lane.b32.xlu0 %v546_v9, %s1636_s21  ;;  %s462_s21 = scalar_lea.vmem %s1953_s5, %s461_s18 }
  0x8d   : > { %527 = vperm.xlu0 %1575, %v498_v2  }
  0x91   : > { %1578 = vset.pattern.permute.xlu0 %v1634_v3  ;;  %v555_v3 = vrot.slane %v483_v0, %v503_v48  ;;  %v852_v48 = vld [vmem:[%s1852_s17 + $0x30] sm:$0xff] }
  0x92   : > { %568 = vperm.xlu0 %1578, %v566_v12  }
  0x93   : > { %v508_v46 = vpop.permute.xlu1 %507 }
  0x94   : > { %v510_v58 = vmin.f32 %v504_v51, %v508_v46  ;;  %v851_v46 = vld [vmem:[%s1852_s17 + $0x28] sm:$0xff]  ;;  %v1499_v51 = vpack.c.bf16 %v853_v50, %v852_v48 }
  0x98   : > { %v517_v47 = vpop.permute.xlu1 %516 }
  0x99   : > { %v519_v59 = vmax.f32 %v514_v52, %v517_v47  ;;  %v854_v52 = vld [vmem:[%s1852_s17 + $0x40] sm:$0xff] }
  0x9b   : > { %v520_v62 = vsub.f32 %v510_v58, %v519_v59  ;;  %v858_v59 = vld [vmem:[%s1852_s17 + $0x60] sm:$0xff] }
  0x9d   : > { %v537_v55 = vpop.permute.xlu1 %536  ;;  %v521_v1 = vmax.f32 %v520_v62, 0.0  ;;  %v860_v62 = vld [vmem:[%s1852_s17 + $0x70] sm:$0xff] }
  0x9e   : > { %v539_v60 = vmax.f32 %v534_v53, %v537_v55  ;;  %v855_v53 = vld [vmem:[%s1852_s17 + $0x48] sm:$0xff]  ;;  %v856_v55 = vld [vmem:[%s1852_s17 + $0x50] sm:$0xff] }
  0xfb   : > { %v549_v21 = vpop.permute.xlu0 %548 }
  0xfc   : > { %v551_v22 = vmul.f32 %v549_v21, %v546_v9  ;;  %v496_v21 = vadd.s32 %v495_v18, %v494_v44  ;;  %v850_v44 = vld [vmem:[%s1852_s17 + $0x20] sm:$0xff] }
  0xfd   : > { %v1495_v47 = vpack.c.bf16 %v851_v46, %v850_v44 }
  0xfe   : > { %558 = vperm.xlu1 %1577, %v551_v22   ;;  %vm497_vm6 = vcmp.lt.s32.totalorder %v496_v21, 289 }
 0x10c   : > { %v528_v56 = vpop.permute.xlu0 %527 }
 0x10d   : > { %v530_v61 = vmin.f32 %v525_v54, %v528_v56  ;;  %v1503_v54 = vpack.c.bf16 %v855_v53, %v854_v52  ;;  %v857_v56 = vld [vmem:[%s1852_s17 + $0x58] sm:$0xff] }
 0x10e   : > { %v1507_v58 = vpack.c.bf16 %v857_v56, %v856_v55 }
 0x10f   : > { %v540_v63 = vsub.f32 %v530_v61, %v539_v60  ;;  %v859_v60 = vld [vmem:[%s1852_s17 + $0x68] sm:$0xff] }
 0x110   : > { %v1511_v61 = vpack.c.bf16 %v859_v60, %v858_v59 }
 0x111   : > { %v541_v2 = vmax.f32 %v540_v63, 0.0  ;;  %v569_v10 = vpop.permute.xlu0 %568  ;;  %v861_v63 = vld [vmem:[%s1852_s17 + $0x78] sm:$0xff] }
 0x112   : > { %vm570_vm5 = vcmp.eq.s32.totalorder %v569_v10, 1  ;;  %v1515_v0 = vpack.c.bf16 %v861_v63, %v860_v62 }
 0x113   : > { %v542_v5 = vmul.f32 %v541_v2, %v521_v1 }
 0x12d   : > { %v811_v1 = vpop.f32.mrb[0].mxu1 }
 0x12e   : > { %v1418_v2 = vpop.f32.mrb[1].mxu1 }
 0x17d   : > { %v559_v4 = vpop.permute.xlu1 %558 }
 0x17e   : > { %v561_v6 = vadd.f32 %v559_v4, %v555_v3  ;;  %v815_v3 = vmax.f32 %v811_v1, 0.0001  ;;  %v486_v4 = vmul.f32 0.5, %v1826_v57 }
 0x180   : > { %v562_v8 = vsub.f32 %v561_v6, %v542_v5 }
 0x182   : > { %v563_v9 = vmax.f32 %v562_v8, 1e-08 }
 0x184   : > { %1579 = vrcp.f32 %v563_v9  ;;  %v820_v9 = vsub.s32 4, %v1805_v43 }
 0x185   : > { %1581 = vrcp.f32 %v1742_v7 }
 0x186   : > { %1583 = vrcp.f32 %v1826_v57 }
 0x18e   : > { %v1580_v12 = vpop.eup %1579 }
 0x18f   : > { %v565_v13 = vmul.f32 %v1580_v12, %v542_v5  ;;  %v1582_v5 = vpop.eup %1581  ;;  %v816_v12 = vmin.f32 %v815_v3, 0.9999 }
 0x191   : > { %v571_v14 = vsel %vm570_vm5, %v565_v13, -1.0  ;;  %v826_v21 = vsub.f32 1.0, %v816_v12 }
 0x192   : > { %v572_v16 = vrot.slane %v571_v14, 4 }
 0x194   : > { %v573_v17 = vmax.f32 %v571_v14, %v572_v16 }
 0x196   : > { %v574_v19 = vrot.slane %v573_v17, 2 }
 0x198   : > { %v575_v20 = vmax.f32 %v573_v17, %v574_v19  ;;  %v1006_v17 = vrot.slane %v1582_v5, 6 }
 0x19a   : > { %v576_v22 = vrot.slane %v575_v20, 1 }
 0x19c   : > { %v577_v23 = vmax.f32 %v575_v20, %v576_v22 }
 0x19e   : > { %vm580_vm7 = vcmp.ge.f32.partialorder %v571_v14, %v577_v23  ;;  %vm668_vm8 = vcmp.ge.f32.partialorder %v577_v23, 0.5  ;;  %vm670_vm9 = vcmp.lt.f32.partialorder %v577_v23, 0.4 }
 0x19f   : > { %v581_v24 = vsel %vm580_vm7, %v1805_v43, 8  ;;  %vm1832_vm10 = vmand %vm668_vm8, %vm497_vm6 }
 0x1a0   : > { %v582_v26 = vrot.slane %v581_v24, 4  ;;  %vm671_vm11 = vmor %vm1832_vm10, %vm670_vm9  ;;  %vm1059_vm9 = vcmask 1040384  }
 0x1a1   : > { %vm1838_vm12 = vmand %vm671_vm11, %vm497_vm6  ;;  %vm1065_vm11 = vcmask 0  }
 0x1a2   : > { %vm583_vm13 = vcmp.lt.s32.totalorder %v581_v24, %v582_v26 }
 0x1a3   : > { %v584_v28 = vsel %vm583_vm13, %v581_v24, %v582_v26 }
 0x1a4   : > { %v585_v29 = vrot.slane %v584_v28, 2 }
 0x1a6   : > { %vm586_vm14 = vcmp.lt.s32.totalorder %v584_v28, %v585_v29 }
 0x1a7   : > { %v587_v30 = vsel %vm586_vm14, %v584_v28, %v585_v29 }
 0x1a8   : > { %v588_v31 = vrot.slane %v587_v30, 1 }
 0x1aa   : > { %vm589_vm15 = vcmp.lt.s32.totalorder %v587_v30, %v588_v31 }
 0x1ab   : > { %v590_v32 = vsel %vm589_vm15, %v587_v30, %v588_v31 }
 0x1ac   : > { %vm591_vm0 = vcmp.eq.s32.totalorder %v1805_v43, %v590_v32 }
 0x1ad   : > { %1380 = vmatpush3.msk.msra.mxu0 %vm591_vm0, %v1640_v34 }
 0x1ae   : > { %1382 = vmatmul.mubr.msk.f32.vlgmr.msra.gmra.mrb[0].mxu0 %vm594_vm1, %v499_v33  ;;  %1486 = vmatprep.subr.bf16.mxu0 %v1637_v15  ;;  %v1641_v33 = vmov 0.75  }
 0x1af   : > { %1451 = vmatprep.mubr.msk.f32.mxu0 %vm1639_vm3, %v1638_v38 }
 0x1b4   : > { %1489 = vmatpush3.bf16.xpose.msk.msra.mxu0 %vm1863_vm4, %v1487_v37 }
 0x1b5   : > { %1490 = vmatprep.subr.bf16.mxu0 %v1637_v15 }
 0x1bc   : > { %1493 = vmatpush3.bf16.xpose.msk.msra.mxu0 %vm1863_vm4, %v1491_v42 }
 0x1bd   : > { %1494 = vmatprep.subr.bf16.mxu0 %v1637_v15 }
 0x1c4   : > { %1497 = vmatpush3.bf16.xpose.msk.msra.mxu0 %vm1863_vm4, %v1495_v47 }
 0x1c5   : > { %1498 = vmatprep.subr.bf16.mxu0 %v1637_v15 }
 0x1cc   : > { %1501 = vmatpush3.bf16.xpose.msk.msra.mxu0 %vm1863_vm4, %v1499_v51  ;;  %v1301_v51 = vsel %vm1832_vm10, 1.0, %v1638_v38 }
 0x1cd   : > { %1502 = vmatprep.subr.bf16.mxu0 %v1637_v15 }
 0x1d4   : > { %1505 = vmatpush3.bf16.xpose.msk.msra.mxu0 %vm1863_vm4, %v1503_v54 }
 0x1d5   : > { %1506 = vmatprep.subr.bf16.mxu0 %v1637_v15 }
 0x1dc   : > { %1509 = vmatpush3.bf16.xpose.msk.msra.mxu0 %vm1863_vm4, %v1507_v58 }
 0x1dd   : > { %1510 = vmatprep.subr.bf16.mxu0 %v1637_v15 }
 0x1e4   : > { %1513 = vmatpush3.bf16.xpose.msk.msra.mxu0 %vm1863_vm4, %v1511_v61 }
 0x1e5   : > { %1514 = vmatprep.subr.bf16.mxu0 %v1637_v15  ;;  %v1584_v15 = vpop.eup %1583 }
 0x1e6   : > { %v1012_v7 = vrot.slane %v1584_v15, 5 }
 0x1ec   : > { %1517 = vmatpush3.bf16.xpose.msk.msra.mxu0 %vm1863_vm4, %v1515_v0 }
 0x1f3   : > { %1452 = vmatmul.mubr.msk.f32.vlgmr.msra.gmra.mrb[2].mxu0 %vm862_vm2, %v1813_v45  ;;  %v487_v45 = vadd.f32 %v486_v4, %v1819_v49  ;;  %v1001_v49 = vrot.slane %v1584_v15, 7 }
 0x1f5   : > { %v997_v57 = vrot.slane %v487_v45, 7 }
 0x281   : > { %v664_v6 = vpop.f32.mrb[0].mxu0 }
 0x282   : > { %v1520_v8 = vtrunc.f32 %v664_v6  ;;  %v984_v10 = vrot.slane %v664_v6, 6  ;;  %v1383_v13 = vpop.f32.mrb[1].mxu0 }
 0x284   : > { %v1521_v14 = vcvt.f32.s32 %v1520_v8  ;;  %v986_v16 = vsub.f32 %v664_v6, %v984_v10 }
 0x286   : > { %v821_v18 = vrot.slane %v1521_v14, %v820_v9  ;;  %v987_v19 = vmul.f32 0.5, %v986_v16  ;;  %v992_v20 = vmax.f32 %v986_v16, 1.0 }
 0x288   : > { %v989_v22 = vrot.slane %v987_v19, 2  ;;  %v1008_v23 = vmul.f32 %v1006_v17, %v992_v20  ;;  %v1014_v24 = vmul.f32 %v1012_v7, %v992_v20  ;;  %vm822_vm1 = vcmp.eq.s32.totalorder %v1805_v43, %v821_v18 }
 0x289   : > { %vm824_vm3 = vmand %vm1832_vm10, %vm822_vm1 }
 0x28a   : > { %v991_v26 = vadd.f32 %v989_v22, %v664_v6  ;;  %v827_v28 = vsel %vm824_vm3, %v816_v12, %v826_v21  ;;  %v825_v34 = vsel %vm824_vm3, 0.25, %v1641_v33 }
 0x28b   : > { %v828_v29 = vsub.f32 1.0, %v827_v28  ;;  %1585 = vlog2.f32 %v827_v28 }
 0x28c   : > { %v993_v30 = vsub.f32 %v991_v26, %v1748_v11  ;;  %v999_v31 = vsub.f32 %v991_v26, %v997_v57  ;;  %1587 = vlog2.f32 %v1008_v23 }
 0x28d   : > { %v829_v32 = vmul.f32 %v828_v29, %v828_v29  ;;  %1589 = vlog2.f32 %v1014_v24 }
 0x28e   : > { %v994_v35 = vmul.f32 %v1582_v5, %v993_v30  ;;  %v1003_v36 = vmul.f32 %v1001_v49, %v999_v31 }
 0x28f   : > { %v830_v37 = vmul.f32 %v829_v32, %v825_v34 }
 0x290   : > { %v995_v27 = vmul.f32 10.0, %v994_v35  ;;  %v1004_v56 = vmul.f32 10.0, %v1003_v36 }
 0x295   : > { %v1586_v39 = vpop.eup %1585 }
 0x296   : > { %v832_v40 = vmul.f32 0.6931472, %v1586_v39  ;;  %v1588_v52 = vpop.eup %1587 }
 0x297   : > { %v1590_v53 = vpop.eup %1589  ;;  %v1010_v54 = vmul.f32 0.6931472, %v1588_v52 }
 0x298   : > { %v833_v43 = vsub.f32 0.0, %v832_v40  ;;  %v1016_v55 = vmul.f32 0.6931472, %v1590_v53 }
 0x299   : > { %v1011_v58 = vmul.f32 5.0, %v1010_v54 }
 0x29a   : > { %v834_v41 = vmul.f32 %v833_v43, %v830_v37  ;;  %v1017_v59 = vmul.f32 5.0, %v1016_v55 }
 0x29c   : > { %v837_v42 = vsel %vm1838_vm12, %v834_v41, 0.0 }
 0x29d   : > { %v838_v44 = vrot.slane %v837_v42, 4 }
 0x29f   : > { %v839_v46 = vadd.f32 %v838_v44, %v837_v42 }
 0x2a1   : > { %v840_v47 = vrot.slane %v839_v46, 2 }
 0x2a3   : > { %v841_v48 = vadd.f32 %v840_v47, %v839_v46 }
 0x2a5   : > { %v842_v11 = vrot.slane %v841_v48, 1 }
 0x2a7   : > { %v843_v50 = vadd.f32 %v842_v11, %v841_v48 }
 0x2a9   : > { %844 = vadd.xlane.f32.xlu1 %v843_v50 }
 0x2ad   : > { %1063 = vadd.xlane.f32.xlu1 %v1301_v51 }
 0x2c6   : > { %v979_v60 = vpop.f32.mrb[2].mxu0 }
 0x2c7   : > { %v1018_v61 = vsub.f32 %v995_v27, %v979_v60  ;;  %v1025_v62 = vsub.f32 %v1004_v56, %v979_v60  ;;  %v1036_v63 = vsub.f32 %v1011_v58, %v979_v60  ;;  %v1047_v0 = vsub.f32 %v1017_v59, %v979_v60  ;;  %v1453_v1 = vpop.f32.mrb[3].mxu0 }
 0x2c9   : > { %v1019_v2 = vand.u32 2147483647, %v1018_v61  ;;  %v1026_v3 = vand.u32 2147483647, %v1025_v62  ;;  %v1037_v38 = vand.u32 2147483647, %v1036_v63 }
 0x2ca   : > { %v1048_v4 = vand.u32 2147483647, %v1047_v0 }
 0x2cb   : > { %v1021_v5 = vmul.f32 4.5, %v1019_v2  ;;  %v1028_v15 = vmul.f32 4.5, %v1026_v3  ;;  %v1338_v9 = vadd.f32 -0.055555556, %v1026_v3  ;;  %v1039_v10 = vmul.f32 4.5, %v1037_v38 }
 0x2cc   : > { %vm1020_vm5 = vcmp.le.f32.partialorder %v1019_v2, 0.11111111  ;;  %vm1027_vm6 = vcmp.le.f32.partialorder %v1026_v3, 0.11111111  ;;  %v1050_v12 = vmul.f32 4.5, %v1048_v4 }
 0x2cd   : > { %v1022_v6 = vmul.f32 %v1021_v5, %v1019_v2  ;;  %v1029_v8 = vmul.f32 %v1028_v15, %v1026_v3  ;;  %v1337_v13 = vadd.f32 -0.055555556, %v1019_v2  ;;  %v1040_v14 = vmul.f32 %v1039_v10, %v1037_v38 }
 0x2ce   : > { %v1339_v16 = vadd.f32 -0.055555556, %v1037_v38  ;;  %vm1038_vm7 = vcmp.le.f32.partialorder %v1037_v38, 0.11111111  ;;  %v1051_v7 = vmul.f32 %v1050_v12, %v1048_v4  ;;  %v1340_v18 = vadd.f32 -0.055555556, %v1048_v4 }
 0x2cf   : > { %v1031_v45 = vsel %vm1027_vm6, %v1029_v8, %v1338_v9  ;;  %v1024_v19 = vsel %vm1020_vm5, %v1022_v6, %v1337_v13  ;;  %vm1049_vm8 = vcmp.le.f32.partialorder %v1048_v4, 0.11111111 }
 0x2d0   : > { %v1033_v17 = vrot.slane %v1031_v45, 1  ;;  %v1042_v20 = vsel %vm1038_vm7, %v1040_v14, %v1339_v16  ;;  %v1053_v22 = vsel %vm1049_vm8, %v1051_v7, %v1340_v18 }
 0x2d1   : > { %v1044_v57 = vrot.slane %v1042_v20, 2  ;;  %v1055_v24 = vrot.slane %v1053_v22, 3 }
 0x2d2   : > { %v1035_v21 = vadd.f32 %v1033_v17, %v1024_v19 }
 0x2d4   : > { %v1046_v23 = vadd.f32 %v1044_v57, %v1035_v21 }
 0x2d6   : > { %v1057_v26 = vadd.f32 %v1055_v24, %v1046_v23 }
 0x2d8   : > { %v1058_v28 = vsel %vm1832_vm10, %v1057_v26, 0.0 }
 0x2d9   : > { %v1060_v49 = vsel %vm1059_vm9, %v1058_v28, 0.0 }
 0x2da   : > { %1061 = vadd.xlane.f32.xlu0 %v1060_v49 }
 0x336   : > { %v845_v29 = vpop.xlane.xlu1 %844 }
 0x337   : > { %1066 = vst.msk [vmem:[%s462_s21] sm:$0x1] %vm1065_vm11, %v845_v29 }
 0x33a   : > { %v1064_v30 = vpop.xlane.xlu1 %1063 }
 0x33b   : > { %1068 = vst.msk [vmem:[%s476_s9] sm:$0x1] %vm1065_vm11, %v1064_v30 }
 0x367   : > { %v1062_v25 = vpop.xlane.xlu0 %1061 }
 0x368   : > { %1067 = vst.msk [vmem:[%s469_s24] sm:$0x1] %vm1065_vm11, %v1062_v25 }
 0x369 PF: > { %s18_s28 = sadd.s32 1, %s1629_s28   ;;  %s1964_s24 = smov %s1621_s26 }
 0x36a   : > { %p15_p8 = scmp.ge.s32.totalorder %s18_s28, 8   ;;  %s1965_s25 = smov %s1625_s27 }
 0x36b   : > { %s1966_s26 = smov %s1969_s29  ;;  %s1967_s27 = smov %s1973_s30 }
 0x36c   :  { %17 = sbr.rel (!%p15_p8) target bundleno = 3 (0x3), region = 106 }

</bundles_post_ra>
